<compile_context>
chip_gen: v6e
topology: v6e:2x2x1
jax: 0.10.0
libtpu: 0.0.40
codegen_flags: <defaults>
</compile_context>

<pallas_src>
import jax
import jax.numpy as jnp
from jax.experimental import pallas as pl
from jax.experimental.pallas import tpu as pltpu

LANE = 128
SUB = 16  # bf16 packs 16 sublanes per vreg; keep batch tiles a multiple of 16.


def _round_up(x, m):
    return (x + m - 1) // m * m


def dqn_kernel(x_ref, w1_ref, b1_ref, w2_ref, b2_ref, w3_ref, b3_ref, o_ref):
    # x read as f32 straight from its HBM tile; bf16 cast is free VPU work
    # under a memory-bound roofline.
    x = x_ref[...].astype(jnp.bfloat16)                       # (tb, in_dim)
    # Layer 1: (tb, in_dim) @ (in_dim, 128) on the MXU, f32 accumulation.
    h1 = jnp.dot(x, w1_ref[...], preferred_element_type=jnp.float32)
    h1 = jnp.maximum(h1 + b1_ref[...], 0.0)                   # bias+ReLU f32
    # Layer 2: (tb, 128) @ (128, 64)
    h2 = jnp.dot(h1.astype(jnp.bfloat16), w2_ref[...],
                 preferred_element_type=jnp.float32)
    h2 = jnp.maximum(h2 + b2_ref[...], 0.0)
    # Layer 3: (tb, 64) @ (64, 128-padded); only the first out_dim lanes are
    # real — store just those (16 B/row instead of a 512 B/row padded slab).
    out = jnp.dot(h2.astype(jnp.bfloat16), w3_ref[...],
                  preferred_element_type=jnp.float32)
    out_dim = o_ref.shape[1]
    o_ref[...] = (out[:, :out_dim] + b3_ref[...]).astype(o_ref.dtype)


def dqn_forward(x, params, *, block_batch=4096):
    """Forward pass. x: (batch, input_dim) f32. Returns (batch, output_dim) f32."""
    w1, b1, w2, b2, w3, b3 = params
    batch, in_dim = x.shape
    h1_dim = w1.shape[1]          # 128
    h2_dim = w2.shape[1]          # 64
    out_dim = w3.shape[1]
    out_pad = _round_up(max(out_dim, LANE), LANE)

    # Batch tile: large (amortizes the ~0.35us per-grid-step overhead),
    # multiple of 16 rows for bf16 sublane packing.
    tb = _round_up(min(block_batch, batch), SUB)
    # Guarantee >= 2 grid steps when the batch allows it so the "parallel"
    # axis shards across both TensorCores on v7x (no effect on v5e/v6e).
    if pl.cdiv(batch, tb) == 1 and batch >= 2 * SUB:
        tb = _round_up(pl.cdiv(batch, 2), SUB)
    grid = (pl.cdiv(batch, tb),)   # unpadded; Pallas masks the edge tile

    # Weight preparation (one-time, tiny): bf16 MXU inputs, w3 lane-padded so
    # the layer-3 matmul output is a full 128-lane accumulator in VMEM.
    w1c = w1.astype(jnp.bfloat16)                                   # (in,128)
    w2c = w2.astype(jnp.bfloat16)                                   # (128,64)
    w3p = jnp.zeros((h2_dim, out_pad), jnp.bfloat16).at[:, :out_dim].set(
        w3.astype(jnp.bfloat16))                                    # (64,128)
    b1f = b1.astype(jnp.float32).reshape(1, h1_dim)
    b2f = b2.astype(jnp.float32).reshape(1, h2_dim)
    b3f = b3.astype(jnp.float32).reshape(1, out_dim)

    # Weights / biases: constant index_map -> DMA'd once, VMEM-resident.
    # (Default double-buffering on them wastes only ~tens of KB; accepted.)
    def resident(arr):
        nd = arr.ndim
        return pl.BlockSpec(arr.shape, lambda i: (0,) * nd)

    out = pl.pallas_call(
        dqn_kernel,
        out_shape=jax.ShapeDtypeStruct((batch, out_dim), jnp.float32),
        grid=grid,
        in_specs=[
            pl.BlockSpec((tb, in_dim), lambda i: (i, 0)),   # x tile, f32
            resident(w1c), resident(b1f),
            resident(w2c), resident(b2f),
            resident(w3p), resident(b3f),
        ],
        out_specs=pl.BlockSpec((tb, out_dim), lambda i: (i, 0)),
        compiler_params=pltpu.CompilerParams(
            dimension_semantics=("parallel",)),
    )(x.astype(jnp.float32), w1c, b1f, w2c, b2f, w3p, b3f)
    return out


def init_params(key, input_dim, output_dim):
    """Deterministic init mimicking PyTorch Linear default (uniform +-1/sqrt(fan_in))."""
    def linear(k, fan_in, fan_out):
        k_w, k_b = jax.random.split(k)
        bound = 1.0 / jnp.sqrt(fan_in)
        w = jax.random.uniform(k_w, (fan_in, fan_out), jnp.float32, -bound, bound)
        b = jax.random.uniform(k_b, (1, fan_out), jnp.float32, -bound, bound)
        return w, b

    k1, k2, k3 = jax.random.split(key, 3)
    w1, b1 = linear(k1, input_dim, 128)
    w2, b2 = linear(k2, 128, 64)
    w3, b3 = linear(k3, 64, output_dim)
    return (w1, b1, w2, b2, w3, b3)


def dqn_reference(x, params):
    w1, b1, w2, b2, w3, b3 = params
    h1 = jnp.maximum(x @ w1 + b1, 0.0)
    h2 = jnp.maximum(h1 @ w2 + b2, 0.0)
    return h2 @ w3 + b3


if __name__ == "__main__":
    batch, input_dim, output_dim = 8, 16, 4

    key = jax.random.PRNGKey(0)
    k_params, k_x = jax.random.split(key)
    params = init_params(k_params, input_dim, output_dim)
    x = jax.random.normal(k_x, (batch, input_dim), jnp.float32)

    out = dqn_forward(x, params)
    jax.block_until_ready(out)

    ref = dqn_reference(x, params)
    assert out.shape == (batch, output_dim)
    # bf16 matmul inputs with f32 accumulation -> compare with relaxed tolerance.
    # TODO(synk): if exact argmax stability of Q-values is required, keep the
    # final layer in f32 end-to-end (kernel is HBM-bound, so it is free).
    assert jnp.allclose(out, ref, atol=3e-2, rtol=3e-2), (
        f"max abs err {jnp.max(jnp.abs(out - ref))}")

    print("KERNEL_OK")
</pallas_src>

<mosaic_0001>
module attributes {stable_mosaic.version = 11 : i64} {
  func.func @dqn_kernel(%arg0: i32, %arg1: memref<16x16xf32, #tpu.memory_space<vmem>>, %arg2: memref<16x128xbf16, #tpu.memory_space<vmem>>, %arg3: memref<1x128xf32, #tpu.memory_space<vmem>>, %arg4: memref<128x64xbf16, #tpu.memory_space<vmem>>, %arg5: memref<1x64xf32, #tpu.memory_space<vmem>>, %arg6: memref<64x128xbf16, #tpu.memory_space<vmem>>, %arg7: memref<1x4xf32, #tpu.memory_space<vmem>>, %arg8: memref<16x4xf32, #tpu.memory_space<vmem>>) attributes {dimension_semantics = [#tpu.dimension_semantics<parallel>], iteration_bounds = array<i64: 1>, scalar_prefetch = 0 : i64, scratch_operands = 0 : i64, tpu.core_type = #tpu.core_type<tc>, window_params = [{transform_indices = @transform_0, window_bounds = array<i64: 16, 16>}, {pipeline_mode = #tpu.pipeline_mode<synchronous>, transform_indices = @transform_1, window_bounds = array<i64: 16, 128>}, {pipeline_mode = #tpu.pipeline_mode<synchronous>, transform_indices = @transform_2, window_bounds = array<i64: 1, 128>}, {pipeline_mode = #tpu.pipeline_mode<synchronous>, transform_indices = @transform_3, window_bounds = array<i64: 128, 64>}, {pipeline_mode = #tpu.pipeline_mode<synchronous>, transform_indices = @transform_4, window_bounds = array<i64: 1, 64>}, {pipeline_mode = #tpu.pipeline_mode<synchronous>, transform_indices = @transform_5, window_bounds = array<i64: 64, 128>}, {pipeline_mode = #tpu.pipeline_mode<synchronous>, transform_indices = @transform_6, window_bounds = array<i64: 1, 4>}, {transform_indices = @transform_7, window_bounds = array<i64: 16, 4>}]} {
    %c0 = arith.constant 0 : index
    %c0_0 = arith.constant 0 : index
    %0 = vector.load %arg1[%c0, %c0_0] : memref<16x16xf32, #tpu.memory_space<vmem>>, vector<16x16xf32>
    %1 = arith.truncf %0 : vector<16x16xf32> to vector<16x16xbf16>
    %c0_1 = arith.constant 0 : index
    %c0_2 = arith.constant 0 : index
    %2 = vector.load %arg2[%c0_1, %c0_2] : memref<16x128xbf16, #tpu.memory_space<vmem>>, vector<16x128xbf16>
    %cst = arith.constant dense<0.000000e+00> : vector<16x128xf32>
    %3 = tpu.matmul %1, %2, %cst {dimension_numbers = #tpu.dot_dimension_numbers<[1], [0], [0], [1], [0, 0, 1, 1], [], []>} : vector<16x16xbf16>, vector<16x128xbf16>, vector<16x128xf32> -> vector<16x128xf32>
    %c0_3 = arith.constant 0 : index
    %c0_4 = arith.constant 0 : index
    %4 = vector.load %arg3[%c0_3, %c0_4] : memref<1x128xf32, #tpu.memory_space<vmem>>, vector<1x128xf32>
    %5 = vector.broadcast %4 : vector<1x128xf32> to vector<16x128xf32>
    %6 = arith.addf %3, %5 : vector<16x128xf32>
    %cst_5 = arith.constant 0.000000e+00 : f32
    %7 = vector.broadcast %cst_5 : f32 to vector<16x128xf32>
    %8 = arith.maximumf %6, %7 : vector<16x128xf32>
    %9 = arith.truncf %8 : vector<16x128xf32> to vector<16x128xbf16>
    %c0_6 = arith.constant 0 : index
    %c0_7 = arith.constant 0 : index
    %10 = vector.load %arg4[%c0_6, %c0_7] : memref<128x64xbf16, #tpu.memory_space<vmem>>, vector<128x64xbf16>
    %cst_8 = arith.constant dense<0.000000e+00> : vector<16x64xf32>
    %11 = tpu.matmul %9, %10, %cst_8 {dimension_numbers = #tpu.dot_dimension_numbers<[1], [0], [0], [1], [0, 0, 1, 1], [], []>} : vector<16x128xbf16>, vector<128x64xbf16>, vector<16x64xf32> -> vector<16x64xf32>
    %c0_9 = arith.constant 0 : index
    %c0_10 = arith.constant 0 : index
    %12 = vector.load %arg5[%c0_9, %c0_10] : memref<1x64xf32, #tpu.memory_space<vmem>>, vector<1x64xf32>
    %13 = vector.broadcast %12 : vector<1x64xf32> to vector<16x64xf32>
    %14 = arith.addf %11, %13 : vector<16x64xf32>
    %cst_11 = arith.constant 0.000000e+00 : f32
    %15 = vector.broadcast %cst_11 : f32 to vector<16x64xf32>
    %16 = arith.maximumf %14, %15 : vector<16x64xf32>
    %17 = arith.truncf %16 : vector<16x64xf32> to vector<16x64xbf16>
    %c0_12 = arith.constant 0 : index
    %c0_13 = arith.constant 0 : index
    %18 = vector.load %arg6[%c0_12, %c0_13] : memref<64x128xbf16, #tpu.memory_space<vmem>>, vector<64x128xbf16>
    %cst_14 = arith.constant dense<0.000000e+00> : vector<16x128xf32>
    %19 = tpu.matmul %17, %18, %cst_14 {dimension_numbers = #tpu.dot_dimension_numbers<[1], [0], [0], [1], [0, 0, 1, 1], [], []>} : vector<16x64xbf16>, vector<64x128xbf16>, vector<16x128xf32> -> vector<16x128xf32>
    %20 = vector.extract_strided_slice %19 {offsets = [0, 0], sizes = [16, 4], strides = [1, 1]} : vector<16x128xf32> to vector<16x4xf32>
    %c0_15 = arith.constant 0 : index
    %c0_16 = arith.constant 0 : index
    %21 = vector.load %arg7[%c0_15, %c0_16] : memref<1x4xf32, #tpu.memory_space<vmem>>, vector<1x4xf32>
    %22 = vector.broadcast %21 : vector<1x4xf32> to vector<16x4xf32>
    %23 = arith.addf %20, %22 : vector<16x4xf32>
    %c0_17 = arith.constant 0 : index
    %c0_18 = arith.constant 0 : index
    %24 = vector.load %arg8[%c0_17, %c0_18] : memref<16x4xf32, #tpu.memory_space<vmem>>, vector<16x4xf32>
    tpu.vector_store %arg8[%c0_17, %c0_18], %23 {strides = array<i32>} : memref<16x4xf32, #tpu.memory_space<vmem>>, vector<16x4xf32>,
    return
  }
  func.func @transform_0(%arg0: i32) -> (i32, i32) {
    %c0_i32 = arith.constant 0 : i32
    %c0_i32_0 = arith.constant 0 : i32
    return %arg0, %c0_i32 : i32, i32
  }
  func.func @transform_1(%arg0: i32) -> (i32, i32) {
    %c0_i32 = arith.constant 0 : i32
    %c0_i32_0 = arith.constant 0 : i32
    %c0_i32_1 = arith.constant 0 : i32
    return %c0_i32, %c0_i32_0 : i32, i32
  }
  func.func @transform_2(%arg0: i32) -> (i32, i32) {
    %c0_i32 = arith.constant 0 : i32
    %c0_i32_0 = arith.constant 0 : i32
    %c0_i32_1 = arith.constant 0 : i32
    return %c0_i32, %c0_i32_0 : i32, i32
  }
  func.func @transform_3(%arg0: i32) -> (i32, i32) {
    %c0_i32 = arith.constant 0 : i32
    %c0_i32_0 = arith.constant 0 : i32
    %c0_i32_1 = arith.constant 0 : i32
    return %c0_i32, %c0_i32_0 : i32, i32
  }
  func.func @transform_4(%arg0: i32) -> (i32, i32) {
    %c0_i32 = arith.constant 0 : i32
    %c0_i32_0 = arith.constant 0 : i32
    %c0_i32_1 = arith.constant 0 : i32
    return %c0_i32, %c0_i32_0 : i32, i32
  }
  func.func @transform_5(%arg0: i32) -> (i32, i32) {
    %c0_i32 = arith.constant 0 : i32
    %c0_i32_0 = arith.constant 0 : i32
    %c0_i32_1 = arith.constant 0 : i32
    return %c0_i32, %c0_i32_0 : i32, i32
  }
  func.func @transform_6(%arg0: i32) -> (i32, i32) {
    %c0_i32 = arith.constant 0 : i32
    %c0_i32_0 = arith.constant 0 : i32
    %c0_i32_1 = arith.constant 0 : i32
    return %c0_i32, %c0_i32_0 : i32, i32
  }
  func.func @transform_7(%arg0: i32) -> (i32, i32) {
    %c0_i32 = arith.constant 0 : i32
    %c0_i32_0 = arith.constant 0 : i32
    return %arg0, %c0_i32 : i32, i32
  }
}

</mosaic_0001>

<bundles_post_ra>
// kernel: tpu_custom_call.1
= control target key start
LH: loop header
LB: loop body
LE: loop exit
PB: predicated region body
PF: predicated region fallthrough
CT: control target
= control target key end

     0   :  { %v425_v1 = vmov 0.0   ;;  %vm426_vm0 = vmmov 0   ;;  %vm45_vm1 = vcmask 130048   ;;  %vm240_vm2 = vcmask 523264   ;;  %s524_s0 = inlined_call_operand.vmem [shape: f32[8,16], index: 0, kind: input, shape index: {}]   ;;  %s525_s1 = inlined_call_operand.vmem [shape: bf16[16,128], index: 1, kind: input, shape index: {}]   ;;  %s526_s2 = inlined_call_operand.vmem [shape: f32[1,128], index: 2, kind: input, shape index: {}]   ;;  %s527_s3 = inlined_call_operand.vmem [shape: bf16[128,64], index: 3, kind: input, shape index: {}]   ;;  %s528_s4 = inlined_call_operand.vmem [shape: f32[1,64], index: 4, kind: input, shape index: {}]   ;;  %s529_s5 = inlined_call_operand.vmem [shape: bf16[64,128], index: 5, kind: input, shape index: {}]   ;;  %s530_s6 = inlined_call_operand.vmem [shape: f32[1,4], index: 6, kind: input, shape index: {}]   ;;  %s531_s7 = inlined_call_operand.vmem [shape: f32[8,4], index: 7, kind: output, shape index: {}]  }
   0x1   :  { %v412_v0 = vld [vmem:[%s525_s1] sm:$0xff]   ;;  %372 = vmatprep.subr.bf16.mxu0 %v425_v1  ;;  %v28_v3 = vld [vmem:[%s524_s0 + $0x8] sm:$0xff]  ;;  %378 = vmatprep.subr.bf16.mxu1 %v425_v1  ;;  %v413_v5 = vld [vmem:[%s527_s3 + $0x38] sm:$0xff]   ;;  %vm294_vm3 = vcmask 31744  }
   0x2   :  { %v27_v2 = vld [vmem:[%s524_s0] sm:$0xff]  ;;  %373 = vmatpush3.bf16.msra.mxu0 %v412_v0  ;;  %374 = vmatprep.mubr.msk.bf16.mxu0 %vm426_vm0, %v425_v1  ;;  %v414_v6 = vld [vmem:[%s527_s3 + $0x30] sm:$0xff]   ;;  %v415_v7 = vld [vmem:[%s527_s3 + $0x28] sm:$0xff]  }
   0x3   :  { %v29_v4 = vpack.c.bf16 %v28_v3, %v27_v2  ;;  %394 = vmatprep.mubr.msk.bf16.mxu1 %vm426_vm0, %v425_v1  ;;  %398 = vmatprep.subr.bf16.mxu0 %v425_v1  ;;  %v416_v8 = vld [vmem:[%s527_s3 + $0x20] sm:$0xff]   ;;  %v417_v9 = vld [vmem:[%s527_s3 + $0x18] sm:$0xff]   ;;  %v418_v10 = vld [vmem:[%s527_s3 + $0x10] sm:$0xff]  }
   0x4   :  { %379 = vmatpush3.bf16.msra.mxu1 %v413_v5  ;;  %v419_v11 = vld [vmem:[%s527_s3 + $0x8] sm:$0xff]   ;;  %v420_v12 = vld [vmem:[%s527_s3] sm:$0xff]   ;;  %v421_v13 = vld [vmem:[%s529_s5 + $0x18] sm:$0xff]  }
   0x5   :  { %375 = vmatmul.mubr.msk.bf16.vlgmr.msra.gmra.mxu0 %vm45_vm1, %v29_v4  ;;  %380 = vmatprep.subr.bf16.mxu1 %v425_v1  ;;  %v338_v14 = vld [vmem:[%s526_s2] ss:$0 sm:$0xff]  ;;  %v422_v24 = vld [vmem:[%s529_s5 + $0x10] sm:$0xff]   ;;  %v423_v25 = vld [vmem:[%s529_s5 + $0x8] sm:$0xff]  }
   0x6   :  { %406 = vmatprep.mubr.msk.bf16.mxu0 %vm426_vm0, %v425_v1  ;;  %399 = vmatpush3.bf16.msra.mxu0 %v421_v13  ;;  %v424_v26 = vld [vmem:[%s529_s5] sm:$0xff]  }
   0x7   :  { %400 = vmatprep.subr.bf16.mxu0 %v425_v1  ;;  %v341_v27 = vld [vmem:[%s528_s4] ss:$0 sm:$0xff] }
   0x8   :  { %381 = vmatpush3.bf16.msra.mxu1 %v414_v6  ;;  %v355_v37 = vld [vmem:[%s530_s6] ss:$0 sm:$0xff] }
   0x9   :  { %382 = vmatprep.subr.bf16.mxu1 %v425_v1 }
   0xa   :  { %401 = vmatpush3.bf16.msra.mxu0 %v422_v24 }
   0xb   :  { %402 = vmatprep.subr.bf16.mxu0 %v425_v1 }
   0xc   :  { %383 = vmatpush3.bf16.msra.mxu1 %v415_v7 }
   0xd   :  { %384 = vmatprep.subr.bf16.mxu1 %v425_v1 }
   0xe   :  { %403 = vmatpush3.bf16.msra.mxu0 %v423_v25 }
   0xf   :  { %404 = vmatprep.subr.bf16.mxu0 %v425_v1 }
  0x10   :  { %385 = vmatpush3.bf16.msra.mxu1 %v416_v8 }
  0x11   :  { %386 = vmatprep.subr.bf16.mxu1 %v425_v1 }
  0x12   :  { %405 = vmatpush3.bf16.msra.mxu0 %v424_v26 }
  0x14   :  { %387 = vmatpush3.bf16.msra.mxu1 %v417_v9 }
  0x15   :  { %388 = vmatprep.subr.bf16.mxu1 %v425_v1 }
  0x18   :  { %389 = vmatpush3.bf16.msra.mxu1 %v418_v10 }
  0x19   :  { %390 = vmatprep.subr.bf16.mxu1 %v425_v1 }
  0x1c   :  { %391 = vmatpush3.bf16.msra.mxu1 %v419_v11 }
  0x1d   :  { %392 = vmatprep.subr.bf16.mxu1 %v425_v1 }
  0x20   :  { %393 = vmatpush3.bf16.msra.mxu1 %v420_v12 }
  0xc5   :  { %v83_v15 = vpop.f32.mrf.mxu0 }
  0xc6   :  { %v84_v17 = vadd.f32 %v338_v14, %v83_v15 }
  0xc7   :  { %v376_v16 = vpop.f32.mrf.mxu0 }
  0xc8   :  { %v90_v21 = vmax.f32 %v84_v17, 0.0 }
  0xc9   :  { %v86_v18 = vpop.f32.mrf.mxu0 }
  0xca   :  { %v87_v19 = vadd.f32 %v338_v14, %v86_v18 }
  0xcb   :  { %v377_v20 = vpop.f32.mrf.mxu0 }
  0xcc   :  { %v91_v22 = vmax.f32 %v87_v19, 0.0 }
  0xce   :  { %v92_v23 = vpack.c.bf16 %v91_v22, %v90_v21 }
  0xd0   :  { %395 = vmatmul.mubr.bf16.vlgmr.msra.gmra.mxu1 %v92_v23 }
 0x190   :  { %v198_v28 = vpop.f32.mrf.mxu1 }
 0x191   :  { %v199_v30 = vadd.f32 %v341_v27, %v198_v28 }
 0x192   :  { %v396_v29 = vpop.f32.mrf.mxu1 }
 0x193   :  { %v205_v34 = vmax.f32 %v199_v30, 0.0 }
 0x194   :  { %v201_v31 = vpop.f32.mrf.mxu1 }
 0x195   :  { %v202_v32 = vadd.f32 %v341_v27, %v201_v31 }
 0x196   :  { %v397_v33 = vpop.f32.mrf.mxu1 }
 0x197   :  { %v206_v35 = vmax.f32 %v202_v32, 0.0 }
 0x199   :  { %v207_v36 = vpack.c.bf16 %v206_v35, %v205_v34 }
 0x19b   :  { %407 = vmatmul.mubr.msk.bf16.vlgmr.msra.gmra.mxu0 %vm240_vm2, %v207_v36 }
 0x25b   :  { %v278_v38 = vpop.f32.mrf.mxu0 }
 0x25c   :  { %v292_v39 = vadd.f32 %v355_v37, %v278_v38 }
 0x25d   :  { %v408_v40 = vpop.f32.mrf.mxu0 }
 0x25e   :  { %295 = vst.msk [vmem:[#allocation2] sm:$0xff] %vm294_vm3, %v292_v39 }
 0x25f   :  { %v281_v41 = vpop.f32.mrf.mxu0 }
 0x261   :  { %v409_v42 = vpop.f32.mrf.mxu0 }
 0x265   :  { %v327_v43 = vld [vmem:[#allocation2] sm:$0xff] }
 0x266   :  { %328 = vst [vmem:[%s531_s7] sm:$0xff] %v327_v43 }

</bundles_post_ra>
